<compile_context>
chip_gen: v5e
topology: v5e:2x2
jax: 0.10.0
libtpu: 0.0.40
codegen_flags: <defaults>
</compile_context>

<pallas_src>
import jax
import jax.numpy as jnp
from jax.experimental import pallas as pl
from jax.experimental.pallas import tpu as pltpu


def _forecastnet_kernel(x_ref, w1x_ref, w1h_ref, w1o_ref, b1_ref,
                        w2_ref, b2_ref, wo_ref, bo_ref, out_ref):
    T = w2_ref.shape[0]
    x = x_ref[...]                       # [B, comb] — resident across all steps

    h2 = None
    out = None
    outs = []
    # T is small and static: fully unroll the sequential decoder inside one invocation.
    for i in range(T):
        # hidden = relu(hidden_layer1[i](next_cell_input)) with the concat replaced
        # by a split matmul; the recurrent terms do not exist at step 0.
        z = jnp.dot(x, w1x_ref[i], preferred_element_type=jnp.float32) + b1_ref[i]
        if i > 0:
            z = z + jnp.dot(h2, w1h_ref[i], preferred_element_type=jnp.float32)
            z = z + jnp.dot(out, w1o_ref[i], preferred_element_type=jnp.float32)
        h1 = jnp.maximum(z, 0.0)

        # hidden = relu(hidden_layer2[i](hidden))
        h2 = jnp.maximum(
            jnp.dot(h1, w2_ref[i], preferred_element_type=jnp.float32) + b2_ref[i],
            0.0)

        # output = output_layer[i](hidden)
        out = jnp.dot(h2, wo_ref[i], preferred_element_type=jnp.float32) + bo_ref[i]
        outs.append(out)

    # Single lane-dense write-back: [B, T * output_dim].
    out_ref[...] = jnp.concatenate(outs, axis=1)


def forecastnet_dense2_forward(x, w1, b1, w2, b2, wo, bo):
    """x: [B, comb]; w1: [T, comb+H+O, H]; w2: [T, H, H]; wo: [T, H, O]; b*: [T, 1, *].

    Returns [T, B, O] (same as the PyTorch module's `outputs`)."""
    T, din_comb, hidden = w1.shape
    odim = wo.shape[2]
    B, comb = x.shape
    assert din_comb == comb + hidden + odim

    # Host-side split of the stacked first-layer weight so the kernel never has to
    # concatenate the state; the zero-padded step-0 rows never touch the hot path.
    w1x = w1[:, :comb, :]                      # [T, comb, H]
    w1h = w1[:, comb:comb + hidden, :]         # [T, H,    H]
    w1o = w1[:, comb + hidden:, :]             # [T, O,    H]

    vmem = pl.BlockSpec(memory_space=pltpu.MemorySpace.VMEM)

    out_flat = pl.pallas_call(
        _forecastnet_kernel,
        out_shape=jax.ShapeDtypeStruct((B, T * odim), jnp.float32),
        in_specs=[vmem] * 9,
        out_specs=vmem,
    )(x, w1x, w1h, w1o, b1, w2, b2, wo, bo)

    # [B, T*O] -> [T, B, O] (layout plumbing done JAX-side, outside the kernel).
    return out_flat.reshape(B, T, odim).transpose(1, 0, 2)


def _reference_forward(x, w1, b1, w2, b2, wo, bo):
    """Pure-JAX mirror of the PyTorch forward (is_training=False)."""
    T = w1.shape[0]
    B = x.shape[0]
    hidden = w2.shape[1]
    odim = wo.shape[2]
    state = jnp.concatenate([x, jnp.zeros((B, hidden + odim), jnp.float32)], axis=1)
    outs = []
    for i in range(T):
        h1 = jax.nn.relu(state @ w1[i] + b1[i])
        h2 = jax.nn.relu(h1 @ w2[i] + b2[i])
        o = h2 @ wo[i] + bo[i]
        outs.append(o)
        state = jnp.concatenate([x, h2, o], axis=1)
    return jnp.stack(outs, axis=0)


def make_params(key, input_dim, hidden_dim, output_dim, in_seq_length, out_seq_length):
    """Deterministic synthetic parameters matching the PyTorch module's shapes."""
    comb = input_dim * in_seq_length
    din_comb = comb + hidden_dim + output_dim
    keys = jax.random.split(key, 8)

    def uni(k, shape, fan_in):
        bound = 1.0 / jnp.sqrt(jnp.float32(fan_in))
        return jax.random.uniform(k, shape, jnp.float32, -bound, bound)

    # hidden_layer1[0]: Linear(comb, hidden) — zero-pad the extra (hidden+output) rows
    # to the common stacked width (those rows are dropped again by the host-side split).
    w1_0 = uni(keys[0], (comb, hidden_dim), comb)
    w1_0 = jnp.concatenate(
        [w1_0, jnp.zeros((hidden_dim + output_dim, hidden_dim), jnp.float32)], axis=0)
    # hidden_layer1[1:]: Linear(comb + hidden + output, hidden)
    w1_rest = uni(keys[1], (out_seq_length - 1, din_comb, hidden_dim), din_comb)
    w1 = jnp.concatenate([w1_0[None], w1_rest], axis=0)
    b1 = uni(keys[2], (out_seq_length, 1, hidden_dim), din_comb)

    w2 = uni(keys[3], (out_seq_length, hidden_dim, hidden_dim), hidden_dim)
    b2 = uni(keys[4], (out_seq_length, 1, hidden_dim), hidden_dim)

    wo = uni(keys[5], (out_seq_length, hidden_dim, output_dim), hidden_dim)
    bo = uni(keys[6], (out_seq_length, 1, output_dim), hidden_dim)

    return w1, b1, w2, b2, wo, bo


if __name__ == "__main__":
    # Small shapes consistent with the module.
    input_dim = 4
    in_seq_length = 8
    hidden_dim = 32
    output_dim = 4
    out_seq_length = 6
    batch = 2
    comb = input_dim * in_seq_length

    key = jax.random.PRNGKey(0)
    k_x, k_p = jax.random.split(key)
    x = jax.random.normal(k_x, (batch, comb), jnp.float32)
    params = make_params(k_p, input_dim, hidden_dim, output_dim,
                         in_seq_length, out_seq_length)

    out = forecastnet_dense2_forward(x, *params)
    out = jax.block_until_ready(out)

    ref = _reference_forward(x, *params)
    assert out.shape == (out_seq_length, batch, output_dim)
    assert jnp.allclose(out, ref, atol=1e-5, rtol=1e-5), "mismatch vs JAX reference"

    print("KERNEL_OK")
</pallas_src>

<mosaic_0001>
module attributes {stable_mosaic.version = 11 : i64} {
  func.func @_forecastnet_kernel(%arg0: memref<2x32xf32, #tpu.memory_space<vmem>>, %arg1: memref<6x32x32xf32, #tpu.memory_space<vmem>>, %arg2: memref<6x32x32xf32, #tpu.memory_space<vmem>>, %arg3: memref<6x4x32xf32, #tpu.memory_space<vmem>>, %arg4: memref<6x1x32xf32, #tpu.memory_space<vmem>>, %arg5: memref<6x32x32xf32, #tpu.memory_space<vmem>>, %arg6: memref<6x1x32xf32, #tpu.memory_space<vmem>>, %arg7: memref<6x32x4xf32, #tpu.memory_space<vmem>>, %arg8: memref<6x1x4xf32, #tpu.memory_space<vmem>>, %arg9: memref<2x24xf32, #tpu.memory_space<vmem>>) attributes {dimension_semantics = [], scalar_prefetch = 0 : i64, scratch_operands = 0 : i64, tpu.core_type = #tpu.core_type<tc>} {
    %c0 = arith.constant 0 : index
    %c0_0 = arith.constant 0 : index
    %0 = vector.load %arg0[%c0, %c0_0] : memref<2x32xf32, #tpu.memory_space<vmem>>, vector<2x32xf32>
    %c0_1 = arith.constant 0 : index
    %c0_2 = arith.constant 0 : index
    %c0_3 = arith.constant 0 : index
    %1 = vector.load %arg1[%c0_1, %c0_2, %c0_3] : memref<6x32x32xf32, #tpu.memory_space<vmem>>, vector<1x32x32xf32>
    %2 = vector.shape_cast %1 : vector<1x32x32xf32> to vector<32x32xf32>
    %cst = arith.constant dense<0.000000e+00> : vector<2x32xf32>
    %3 = tpu.matmul %0, %2, %cst {dimension_numbers = #tpu.dot_dimension_numbers<[1], [0], [0], [1], [0, 0, 1, 1], [], []>} : vector<2x32xf32>, vector<32x32xf32>, vector<2x32xf32> -> vector<2x32xf32>
    %c0_4 = arith.constant 0 : index
    %c0_5 = arith.constant 0 : index
    %c0_6 = arith.constant 0 : index
    %4 = vector.load %arg4[%c0_4, %c0_5, %c0_6] : memref<6x1x32xf32, #tpu.memory_space<vmem>>, vector<1x1x32xf32>
    %5 = vector.shape_cast %4 : vector<1x1x32xf32> to vector<1x32xf32>
    %6 = vector.broadcast %5 : vector<1x32xf32> to vector<2x32xf32>
    %7 = arith.addf %3, %6 : vector<2x32xf32>
    %cst_7 = arith.constant 0.000000e+00 : f32
    %8 = vector.broadcast %cst_7 : f32 to vector<2x32xf32>
    %9 = arith.maximumf %7, %8 : vector<2x32xf32>
    %c0_8 = arith.constant 0 : index
    %c0_9 = arith.constant 0 : index
    %c0_10 = arith.constant 0 : index
    %10 = vector.load %arg5[%c0_8, %c0_9, %c0_10] : memref<6x32x32xf32, #tpu.memory_space<vmem>>, vector<1x32x32xf32>
    %11 = vector.shape_cast %10 : vector<1x32x32xf32> to vector<32x32xf32>
    %cst_11 = arith.constant dense<0.000000e+00> : vector<2x32xf32>
    %12 = tpu.matmul %9, %11, %cst_11 {dimension_numbers = #tpu.dot_dimension_numbers<[1], [0], [0], [1], [0, 0, 1, 1], [], []>} : vector<2x32xf32>, vector<32x32xf32>, vector<2x32xf32> -> vector<2x32xf32>
    %c0_12 = arith.constant 0 : index
    %c0_13 = arith.constant 0 : index
    %c0_14 = arith.constant 0 : index
    %13 = vector.load %arg6[%c0_12, %c0_13, %c0_14] : memref<6x1x32xf32, #tpu.memory_space<vmem>>, vector<1x1x32xf32>
    %14 = vector.shape_cast %13 : vector<1x1x32xf32> to vector<1x32xf32>
    %15 = vector.broadcast %14 : vector<1x32xf32> to vector<2x32xf32>
    %16 = arith.addf %12, %15 : vector<2x32xf32>
    %cst_15 = arith.constant 0.000000e+00 : f32
    %17 = vector.broadcast %cst_15 : f32 to vector<2x32xf32>
    %18 = arith.maximumf %16, %17 : vector<2x32xf32>
    %c0_16 = arith.constant 0 : index
    %c0_17 = arith.constant 0 : index
    %c0_18 = arith.constant 0 : index
    %19 = vector.load %arg7[%c0_16, %c0_17, %c0_18] : memref<6x32x4xf32, #tpu.memory_space<vmem>>, vector<1x32x4xf32>
    %20 = vector.shape_cast %19 : vector<1x32x4xf32> to vector<32x4xf32>
    %cst_19 = arith.constant dense<0.000000e+00> : vector<2x4xf32>
    %21 = tpu.matmul %18, %20, %cst_19 {dimension_numbers = #tpu.dot_dimension_numbers<[1], [0], [0], [1], [0, 0, 1, 1], [], []>} : vector<2x32xf32>, vector<32x4xf32>, vector<2x4xf32> -> vector<2x4xf32>
    %c0_20 = arith.constant 0 : index
    %c0_21 = arith.constant 0 : index
    %c0_22 = arith.constant 0 : index
    %22 = vector.load %arg8[%c0_20, %c0_21, %c0_22] : memref<6x1x4xf32, #tpu.memory_space<vmem>>, vector<1x1x4xf32>
    %23 = vector.shape_cast %22 : vector<1x1x4xf32> to vector<1x4xf32>
    %24 = vector.broadcast %23 : vector<1x4xf32> to vector<2x4xf32>
    %25 = arith.addf %21, %24 : vector<2x4xf32>
    %c1 = arith.constant 1 : index
    %c0_23 = arith.constant 0 : index
    %c0_24 = arith.constant 0 : index
    %26 = vector.load %arg1[%c1, %c0_23, %c0_24] : memref<6x32x32xf32, #tpu.memory_space<vmem>>, vector<1x32x32xf32>
    %27 = vector.shape_cast %26 : vector<1x32x32xf32> to vector<32x32xf32>
    %cst_25 = arith.constant dense<0.000000e+00> : vector<2x32xf32>
    %28 = tpu.matmul %0, %27, %cst_25 {dimension_numbers = #tpu.dot_dimension_numbers<[1], [0], [0], [1], [0, 0, 1, 1], [], []>} : vector<2x32xf32>, vector<32x32xf32>, vector<2x32xf32> -> vector<2x32xf32>
    %c1_26 = arith.constant 1 : index
    %c0_27 = arith.constant 0 : index
    %c0_28 = arith.constant 0 : index
    %29 = vector.load %arg4[%c1_26, %c0_27, %c0_28] : memref<6x1x32xf32, #tpu.memory_space<vmem>>, vector<1x1x32xf32>
    %30 = vector.shape_cast %29 : vector<1x1x32xf32> to vector<1x32xf32>
    %31 = vector.broadcast %30 : vector<1x32xf32> to vector<2x32xf32>
    %32 = arith.addf %28, %31 : vector<2x32xf32>
    %c1_29 = arith.constant 1 : index
    %c0_30 = arith.constant 0 : index
    %c0_31 = arith.constant 0 : index
    %33 = vector.load %arg2[%c1_29, %c0_30, %c0_31] : memref<6x32x32xf32, #tpu.memory_space<vmem>>, vector<1x32x32xf32>
    %34 = vector.shape_cast %33 : vector<1x32x32xf32> to vector<32x32xf32>
    %cst_32 = arith.constant dense<0.000000e+00> : vector<2x32xf32>
    %35 = tpu.matmul %18, %34, %cst_32 {dimension_numbers = #tpu.dot_dimension_numbers<[1], [0], [0], [1], [0, 0, 1, 1], [], []>} : vector<2x32xf32>, vector<32x32xf32>, vector<2x32xf32> -> vector<2x32xf32>
    %36 = arith.addf %32, %35 : vector<2x32xf32>
    %c1_33 = arith.constant 1 : index
    %c0_34 = arith.constant 0 : index
    %c0_35 = arith.constant 0 : index
    %37 = vector.load %arg3[%c1_33, %c0_34, %c0_35] : memref<6x4x32xf32, #tpu.memory_space<vmem>>, vector<1x4x32xf32>
    %38 = vector.shape_cast %37 : vector<1x4x32xf32> to vector<4x32xf32>
    %cst_36 = arith.constant dense<0.000000e+00> : vector<2x32xf32>
    %39 = tpu.matmul %25, %38, %cst_36 {dimension_numbers = #tpu.dot_dimension_numbers<[1], [0], [0], [1], [0, 0, 1, 1], [], []>} : vector<2x4xf32>, vector<4x32xf32>, vector<2x32xf32> -> vector<2x32xf32>
    %40 = arith.addf %36, %39 : vector<2x32xf32>
    %cst_37 = arith.constant 0.000000e+00 : f32
    %41 = vector.broadcast %cst_37 : f32 to vector<2x32xf32>
    %42 = arith.maximumf %40, %41 : vector<2x32xf32>
    %c1_38 = arith.constant 1 : index
    %c0_39 = arith.constant 0 : index
    %c0_40 = arith.constant 0 : index
    %43 = vector.load %arg5[%c1_38, %c0_39, %c0_40] : memref<6x32x32xf32, #tpu.memory_space<vmem>>, vector<1x32x32xf32>
    %44 = vector.shape_cast %43 : vector<1x32x32xf32> to vector<32x32xf32>
    %cst_41 = arith.constant dense<0.000000e+00> : vector<2x32xf32>
    %45 = tpu.matmul %42, %44, %cst_41 {dimension_numbers = #tpu.dot_dimension_numbers<[1], [0], [0], [1], [0, 0, 1, 1], [], []>} : vector<2x32xf32>, vector<32x32xf32>, vector<2x32xf32> -> vector<2x32xf32>
    %c1_42 = arith.constant 1 : index
    %c0_43 = arith.constant 0 : index
    %c0_44 = arith.constant 0 : index
    %46 = vector.load %arg6[%c1_42, %c0_43, %c0_44] : memref<6x1x32xf32, #tpu.memory_space<vmem>>, vector<1x1x32xf32>
    %47 = vector.shape_cast %46 : vector<1x1x32xf32> to vector<1x32xf32>
    %48 = vector.broadcast %47 : vector<1x32xf32> to vector<2x32xf32>
    %49 = arith.addf %45, %48 : vector<2x32xf32>
    %cst_45 = arith.constant 0.000000e+00 : f32
    %50 = vector.broadcast %cst_45 : f32 to vector<2x32xf32>
    %51 = arith.maximumf %49, %50 : vector<2x32xf32>
    %c1_46 = arith.constant 1 : index
    %c0_47 = arith.constant 0 : index
    %c0_48 = arith.constant 0 : index
    %52 = vector.load %arg7[%c1_46, %c0_47, %c0_48] : memref<6x32x4xf32, #tpu.memory_space<vmem>>, vector<1x32x4xf32>
    %53 = vector.shape_cast %52 : vector<1x32x4xf32> to vector<32x4xf32>
    %cst_49 = arith.constant dense<0.000000e+00> : vector<2x4xf32>
    %54 = tpu.matmul %51, %53, %cst_49 {dimension_numbers = #tpu.dot_dimension_numbers<[1], [0], [0], [1], [0, 0, 1, 1], [], []>} : vector<2x32xf32>, vector<32x4xf32>, vector<2x4xf32> -> vector<2x4xf32>
    %c1_50 = arith.constant 1 : index
    %c0_51 = arith.constant 0 : index
    %c0_52 = arith.constant 0 : index
    %55 = vector.load %arg8[%c1_50, %c0_51, %c0_52] : memref<6x1x4xf32, #tpu.memory_space<vmem>>, vector<1x1x4xf32>
    %56 = vector.shape_cast %55 : vector<1x1x4xf32> to vector<1x4xf32>
    %57 = vector.broadcast %56 : vector<1x4xf32> to vector<2x4xf32>
    %58 = arith.addf %54, %57 : vector<2x4xf32>
    %c2 = arith.constant 2 : index
    %c0_53 = arith.constant 0 : index
    %c0_54 = arith.constant 0 : index
    %59 = vector.load %arg1[%c2, %c0_53, %c0_54] : memref<6x32x32xf32, #tpu.memory_space<vmem>>, vector<1x32x32xf32>
    %60 = vector.shape_cast %59 : vector<1x32x32xf32> to vector<32x32xf32>
    %cst_55 = arith.constant dense<0.000000e+00> : vector<2x32xf32>
    %61 = tpu.matmul %0, %60, %cst_55 {dimension_numbers = #tpu.dot_dimension_numbers<[1], [0], [0], [1], [0, 0, 1, 1], [], []>} : vector<2x32xf32>, vector<32x32xf32>, vector<2x32xf32> -> vector<2x32xf32>
    %c2_56 = arith.constant 2 : index
    %c0_57 = arith.constant 0 : index
    %c0_58 = arith.constant 0 : index
    %62 = vector.load %arg4[%c2_56, %c0_57, %c0_58] : memref<6x1x32xf32, #tpu.memory_space<vmem>>, vector<1x1x32xf32>
    %63 = vector.shape_cast %62 : vector<1x1x32xf32> to vector<1x32xf32>
    %64 = vector.broadcast %63 : vector<1x32xf32> to vector<2x32xf32>
    %65 = arith.addf %61, %64 : vector<2x32xf32>
    %c2_59 = arith.constant 2 : index
    %c0_60 = arith.constant 0 : index
    %c0_61 = arith.constant 0 : index
    %66 = vector.load %arg2[%c2_59, %c0_60, %c0_61] : memref<6x32x32xf32, #tpu.memory_space<vmem>>, vector<1x32x32xf32>
    %67 = vector.shape_cast %66 : vector<1x32x32xf32> to vector<32x32xf32>
    %cst_62 = arith.constant dense<0.000000e+00> : vector<2x32xf32>
    %68 = tpu.matmul %51, %67, %cst_62 {dimension_numbers = #tpu.dot_dimension_numbers<[1], [0], [0], [1], [0, 0, 1, 1], [], []>} : vector<2x32xf32>, vector<32x32xf32>, vector<2x32xf32> -> vector<2x32xf32>
    %69 = arith.addf %65, %68 : vector<2x32xf32>
    %c2_63 = arith.constant 2 : index
    %c0_64 = arith.constant 0 : index
    %c0_65 = arith.constant 0 : index
    %70 = vector.load %arg3[%c2_63, %c0_64, %c0_65] : memref<6x4x32xf32, #tpu.memory_space<vmem>>, vector<1x4x32xf32>
    %71 = vector.shape_cast %70 : vector<1x4x32xf32> to vector<4x32xf32>
    %cst_66 = arith.constant dense<0.000000e+00> : vector<2x32xf32>
    %72 = tpu.matmul %58, %71, %cst_66 {dimension_numbers = #tpu.dot_dimension_numbers<[1], [0], [0], [1], [0, 0, 1, 1], [], []>} : vector<2x4xf32>, vector<4x32xf32>, vector<2x32xf32> -> vector<2x32xf32>
    %73 = arith.addf %69, %72 : vector<2x32xf32>
    %cst_67 = arith.constant 0.000000e+00 : f32
    %74 = vector.broadcast %cst_67 : f32 to vector<2x32xf32>
    %75 = arith.maximumf %73, %74 : vector<2x32xf32>
    %c2_68 = arith.constant 2 : index
    %c0_69 = arith.constant 0 : index
    %c0_70 = arith.constant 0 : index
    %76 = vector.load %arg5[%c2_68, %c0_69, %c0_70] : memref<6x32x32xf32, #tpu.memory_space<vmem>>, vector<1x32x32xf32>
    %77 = vector.shape_cast %76 : vector<1x32x32xf32> to vector<32x32xf32>
    %cst_71 = arith.constant dense<0.000000e+00> : vector<2x32xf32>
    %78 = tpu.matmul %75, %77, %cst_71 {dimension_numbers = #tpu.dot_dimension_numbers<[1], [0], [0], [1], [0, 0, 1, 1], [], []>} : vector<2x32xf32>, vector<32x32xf32>, vector<2x32xf32> -> vector<2x32xf32>
    %c2_72 = arith.constant 2 : index
    %c0_73 = arith.constant 0 : index
    %c0_74 = arith.constant 0 : index
    %79 = vector.load %arg6[%c2_72, %c0_73, %c0_74] : memref<6x1x32xf32, #tpu.memory_space<vmem>>, vector<1x1x32xf32>
    %80 = vector.shape_cast %79 : vector<1x1x32xf32> to vector<1x32xf32>
    %81 = vector.broadcast %80 : vector<1x32xf32> to vector<2x32xf32>
    %82 = arith.addf %78, %81 : vector<2x32xf32>
    %cst_75 = arith.constant 0.000000e+00 : f32
    %83 = vector.broadcast %cst_75 : f32 to vector<2x32xf32>
    %84 = arith.maximumf %82, %83 : vector<2x32xf32>
    %c2_76 = arith.constant 2 : index
    %c0_77 = arith.constant 0 : index
    %c0_78 = arith.constant 0 : index
    %85 = vector.load %arg7[%c2_76, %c0_77, %c0_78] : memref<6x32x4xf32, #tpu.memory_space<vmem>>, vector<1x32x4xf32>
    %86 = vector.shape_cast %85 : vector<1x32x4xf32> to vector<32x4xf32>
    %cst_79 = arith.constant dense<0.000000e+00> : vector<2x4xf32>
    %87 = tpu.matmul %84, %86, %cst_79 {dimension_numbers = #tpu.dot_dimension_numbers<[1], [0], [0], [1], [0, 0, 1, 1], [], []>} : vector<2x32xf32>, vector<32x4xf32>, vector<2x4xf32> -> vector<2x4xf32>
    %c2_80 = arith.constant 2 : index
    %c0_81 = arith.constant 0 : index
    %c0_82 = arith.constant 0 : index
    %88 = vector.load %arg8[%c2_80, %c0_81, %c0_82] : memref<6x1x4xf32, #tpu.memory_space<vmem>>, vector<1x1x4xf32>
    %89 = vector.shape_cast %88 : vector<1x1x4xf32> to vector<1x4xf32>
    %90 = vector.broadcast %89 : vector<1x4xf32> to vector<2x4xf32>
    %91 = arith.addf %87, %90 : vector<2x4xf32>
    %c3 = arith.constant 3 : index
    %c0_83 = arith.constant 0 : index
    %c0_84 = arith.constant 0 : index
    %92 = vector.load %arg1[%c3, %c0_83, %c0_84] : memref<6x32x32xf32, #tpu.memory_space<vmem>>, vector<1x32x32xf32>
    %93 = vector.shape_cast %92 : vector<1x32x32xf32> to vector<32x32xf32>
    %cst_85 = arith.constant dense<0.000000e+00> : vector<2x32xf32>
    %94 = tpu.matmul %0, %93, %cst_85 {dimension_numbers = #tpu.dot_dimension_numbers<[1], [0], [0], [1], [0, 0, 1, 1], [], []>} : vector<2x32xf32>, vector<32x32xf32>, vector<2x32xf32> -> vector<2x32xf32>
    %c3_86 = arith.constant 3 : index
    %c0_87 = arith.constant 0 : index
    %c0_88 = arith.constant 0 : index
    %95 = vector.load %arg4[%c3_86, %c0_87, %c0_88] : memref<6x1x32xf32, #tpu.memory_space<vmem>>, vector<1x1x32xf32>
    %96 = vector.shape_cast %95 : vector<1x1x32xf32> to vector<1x32xf32>
    %97 = vector.broadcast %96 : vector<1x32xf32> to vector<2x32xf32>
    %98 = arith.addf %94, %97 : vector<2x32xf32>
    %c3_89 = arith.constant 3 : index
    %c0_90 = arith.constant 0 : index
    %c0_91 = arith.constant 0 : index
    %99 = vector.load %arg2[%c3_89, %c0_90, %c0_91] : memref<6x32x32xf32, #tpu.memory_space<vmem>>, vector<1x32x32xf32>
    %100 = vector.shape_cast %99 : vector<1x32x32xf32> to vector<32x32xf32>
    %cst_92 = arith.constant dense<0.000000e+00> : vector<2x32xf32>
    %101 = tpu.matmul %84, %100, %cst_92 {dimension_numbers = #tpu.dot_dimension_numbers<[1], [0], [0], [1], [0, 0, 1, 1], [], []>} : vector<2x32xf32>, vector<32x32xf32>, vector<2x32xf32> -> vector<2x32xf32>
    %102 = arith.addf %98, %101 : vector<2x32xf32>
    %c3_93 = arith.constant 3 : index
    %c0_94 = arith.constant 0 : index
    %c0_95 = arith.constant 0 : index
    %103 = vector.load %arg3[%c3_93, %c0_94, %c0_95] : memref<6x4x32xf32, #tpu.memory_space<vmem>>, vector<1x4x32xf32>
    %104 = vector.shape_cast %103 : vector<1x4x32xf32> to vector<4x32xf32>
    %cst_96 = arith.constant dense<0.000000e+00> : vector<2x32xf32>
    %105 = tpu.matmul %91, %104, %cst_96 {dimension_numbers = #tpu.dot_dimension_numbers<[1], [0], [0], [1], [0, 0, 1, 1], [], []>} : vector<2x4xf32>, vector<4x32xf32>, vector<2x32xf32> -> vector<2x32xf32>
    %106 = arith.addf %102, %105 : vector<2x32xf32>
    %cst_97 = arith.constant 0.000000e+00 : f32
    %107 = vector.broadcast %cst_97 : f32 to vector<2x32xf32>
    %108 = arith.maximumf %106, %107 : vector<2x32xf32>
    %c3_98 = arith.constant 3 : index
    %c0_99 = arith.constant 0 : index
    %c0_100 = arith.constant 0 : index
    %109 = vector.load %arg5[%c3_98, %c0_99, %c0_100] : memref<6x32x32xf32, #tpu.memory_space<vmem>>, vector<1x32x32xf32>
    %110 = vector.shape_cast %109 : vector<1x32x32xf32> to vector<32x32xf32>
    %cst_101 = arith.constant dense<0.000000e+00> : vector<2x32xf32>
    %111 = tpu.matmul %108, %110, %cst_101 {dimension_numbers = #tpu.dot_dimension_numbers<[1], [0], [0], [1], [0, 0, 1, 1], [], []>} : vector<2x32xf32>, vector<32x32xf32>, vector<2x32xf32> -> vector<2x32xf32>
    %c3_102 = arith.constant 3 : index
    %c0_103 = arith.constant 0 : index
    %c0_104 = arith.constant 0 : index
    %112 = vector.load %arg6[%c3_102, %c0_103, %c0_104] : memref<6x1x32xf32, #tpu.memory_space<vmem>>, vector<1x1x32xf32>
    %113 = vector.shape_cast %112 : vector<1x1x32xf32> to vector<1x32xf32>
    %114 = vector.broadcast %113 : vector<1x32xf32> to vector<2x32xf32>
    %115 = arith.addf %111, %114 : vector<2x32xf32>
    %cst_105 = arith.constant 0.000000e+00 : f32
    %116 = vector.broadcast %cst_105 : f32 to vector<2x32xf32>
    %117 = arith.maximumf %115, %116 : vector<2x32xf32>
    %c3_106 = arith.constant 3 : index
    %c0_107 = arith.constant 0 : index
    %c0_108 = arith.constant 0 : index
    %118 = vector.load %arg7[%c3_106, %c0_107, %c0_108] : memref<6x32x4xf32, #tpu.memory_space<vmem>>, vector<1x32x4xf32>
    %119 = vector.shape_cast %118 : vector<1x32x4xf32> to vector<32x4xf32>
    %cst_109 = arith.constant dense<0.000000e+00> : vector<2x4xf32>
    %120 = tpu.matmul %117, %119, %cst_109 {dimension_numbers = #tpu.dot_dimension_numbers<[1], [0], [0], [1], [0, 0, 1, 1], [], []>} : vector<2x32xf32>, vector<32x4xf32>, vector<2x4xf32> -> vector<2x4xf32>
    %c3_110 = arith.constant 3 : index
    %c0_111 = arith.constant 0 : index
    %c0_112 = arith.constant 0 : index
    %121 = vector.load %arg8[%c3_110, %c0_111, %c0_112] : memref<6x1x4xf32, #tpu.memory_space<vmem>>, vector<1x1x4xf32>
    %122 = vector.shape_cast %121 : vector<1x1x4xf32> to vector<1x4xf32>
    %123 = vector.broadcast %122 : vector<1x4xf32> to vector<2x4xf32>
    %124 = arith.addf %120, %123 : vector<2x4xf32>
    %c4 = arith.constant 4 : index
    %c0_113 = arith.constant 0 : index
    %c0_114 = arith.constant 0 : index
    %125 = vector.load %arg1[%c4, %c0_113, %c0_114] : memref<6x32x32xf32, #tpu.memory_space<vmem>>, vector<1x32x32xf32>
    %126 = vector.shape_cast %125 : vector<1x32x32xf32> to vector<32x32xf32>
    %cst_115 = arith.constant dense<0.000000e+00> : vector<2x32xf32>
    %127 = tpu.matmul %0, %126, %cst_115 {dimension_numbers = #tpu.dot_dimension_numbers<[1], [0], [0], [1], [0, 0, 1, 1], [], []>} : vector<2x32xf32>, vector<32x32xf32>, vector<2x32xf32> -> vector<2x32xf32>
    %c4_116 = arith.constant 4 : index
    %c0_117 = arith.constant 0 : index
    %c0_118 = arith.constant 0 : index
    %128 = vector.load %arg4[%c4_116, %c0_117, %c0_118] : memref<6x1x32xf32, #tpu.memory_space<vmem>>, vector<1x1x32xf32>
    %129 = vector.shape_cast %128 : vector<1x1x32xf32> to vector<1x32xf32>
    %130 = vector.broadcast %129 : vector<1x32xf32> to vector<2x32xf32>
    %131 = arith.addf %127, %130 : vector<2x32xf32>
    %c4_119 = arith.constant 4 : index
    %c0_120 = arith.constant 0 : index
    %c0_121 = arith.constant 0 : index
    %132 = vector.load %arg2[%c4_119, %c0_120, %c0_121] : memref<6x32x32xf32, #tpu.memory_space<vmem>>, vector<1x32x32xf32>
    %133 = vector.shape_cast %132 : vector<1x32x32xf32> to vector<32x32xf32>
    %cst_122 = arith.constant dense<0.000000e+00> : vector<2x32xf32>
    %134 = tpu.matmul %117, %133, %cst_122 {dimension_numbers = #tpu.dot_dimension_numbers<[1], [0], [0], [1], [0, 0, 1, 1], [], []>} : vector<2x32xf32>, vector<32x32xf32>, vector<2x32xf32> -> vector<2x32xf32>
    %135 = arith.addf %131, %134 : vector<2x32xf32>
    %c4_123 = arith.constant 4 : index
    %c0_124 = arith.constant 0 : index
    %c0_125 = arith.constant 0 : index
    %136 = vector.load %arg3[%c4_123, %c0_124, %c0_125] : memref<6x4x32xf32, #tpu.memory_space<vmem>>, vector<1x4x32xf32>
    %137 = vector.shape_cast %136 : vector<1x4x32xf32> to vector<4x32xf32>
    %cst_126 = arith.constant dense<0.000000e+00> : vector<2x32xf32>
    %138 = tpu.matmul %124, %137, %cst_126 {dimension_numbers = #tpu.dot_dimension_numbers<[1], [0], [0], [1], [0, 0, 1, 1], [], []>} : vector<2x4xf32>, vector<4x32xf32>, vector<2x32xf32> -> vector<2x32xf32>
    %139 = arith.addf %135, %138 : vector<2x32xf32>
    %cst_127 = arith.constant 0.000000e+00 : f32
    %140 = vector.broadcast %cst_127 : f32 to vector<2x32xf32>
    %141 = arith.maximumf %139, %140 : vector<2x32xf32>
    %c4_128 = arith.constant 4 : index
    %c0_129 = arith.constant 0 : index
    %c0_130 = arith.constant 0 : index
    %142 = vector.load %arg5[%c4_128, %c0_129, %c0_130] : memref<6x32x32xf32, #tpu.memory_space<vmem>>, vector<1x32x32xf32>
    %143 = vector.shape_cast %142 : vector<1x32x32xf32> to vector<32x32xf32>
    %cst_131 = arith.constant dense<0.000000e+00> : vector<2x32xf32>
    %144 = tpu.matmul %141, %143, %cst_131 {dimension_numbers = #tpu.dot_dimension_numbers<[1], [0], [0], [1], [0, 0, 1, 1], [], []>} : vector<2x32xf32>, vector<32x32xf32>, vector<2x32xf32> -> vector<2x32xf32>
    %c4_132 = arith.constant 4 : index
    %c0_133 = arith.constant 0 : index
    %c0_134 = arith.constant 0 : index
    %145 = vector.load %arg6[%c4_132, %c0_133, %c0_134] : memref<6x1x32xf32, #tpu.memory_space<vmem>>, vector<1x1x32xf32>
    %146 = vector.shape_cast %145 : vector<1x1x32xf32> to vector<1x32xf32>
    %147 = vector.broadcast %146 : vector<1x32xf32> to vector<2x32xf32>
    %148 = arith.addf %144, %147 : vector<2x32xf32>
    %cst_135 = arith.constant 0.000000e+00 : f32
    %149 = vector.broadcast %cst_135 : f32 to vector<2x32xf32>
    %150 = arith.maximumf %148, %149 : vector<2x32xf32>
    %c4_136 = arith.constant 4 : index
    %c0_137 = arith.constant 0 : index
    %c0_138 = arith.constant 0 : index
    %151 = vector.load %arg7[%c4_136, %c0_137, %c0_138] : memref<6x32x4xf32, #tpu.memory_space<vmem>>, vector<1x32x4xf32>
    %152 = vector.shape_cast %151 : vector<1x32x4xf32> to vector<32x4xf32>
    %cst_139 = arith.constant dense<0.000000e+00> : vector<2x4xf32>
    %153 = tpu.matmul %150, %152, %cst_139 {dimension_numbers = #tpu.dot_dimension_numbers<[1], [0], [0], [1], [0, 0, 1, 1], [], []>} : vector<2x32xf32>, vector<32x4xf32>, vector<2x4xf32> -> vector<2x4xf32>
    %c4_140 = arith.constant 4 : index
    %c0_141 = arith.constant 0 : index
    %c0_142 = arith.constant 0 : index
    %154 = vector.load %arg8[%c4_140, %c0_141, %c0_142] : memref<6x1x4xf32, #tpu.memory_space<vmem>>, vector<1x1x4xf32>
    %155 = vector.shape_cast %154 : vector<1x1x4xf32> to vector<1x4xf32>
    %156 = vector.broadcast %155 : vector<1x4xf32> to vector<2x4xf32>
    %157 = arith.addf %153, %156 : vector<2x4xf32>
    %c5 = arith.constant 5 : index
    %c0_143 = arith.constant 0 : index
    %c0_144 = arith.constant 0 : index
    %158 = vector.load %arg1[%c5, %c0_143, %c0_144] : memref<6x32x32xf32, #tpu.memory_space<vmem>>, vector<1x32x32xf32>
    %159 = vector.shape_cast %158 : vector<1x32x32xf32> to vector<32x32xf32>
    %cst_145 = arith.constant dense<0.000000e+00> : vector<2x32xf32>
    %160 = tpu.matmul %0, %159, %cst_145 {dimension_numbers = #tpu.dot_dimension_numbers<[1], [0], [0], [1], [0, 0, 1, 1], [], []>} : vector<2x32xf32>, vector<32x32xf32>, vector<2x32xf32> -> vector<2x32xf32>
    %c5_146 = arith.constant 5 : index
    %c0_147 = arith.constant 0 : index
    %c0_148 = arith.constant 0 : index
    %161 = vector.load %arg4[%c5_146, %c0_147, %c0_148] : memref<6x1x32xf32, #tpu.memory_space<vmem>>, vector<1x1x32xf32>
    %162 = vector.shape_cast %161 : vector<1x1x32xf32> to vector<1x32xf32>
    %163 = vector.broadcast %162 : vector<1x32xf32> to vector<2x32xf32>
    %164 = arith.addf %160, %163 : vector<2x32xf32>
    %c5_149 = arith.constant 5 : index
    %c0_150 = arith.constant 0 : index
    %c0_151 = arith.constant 0 : index
    %165 = vector.load %arg2[%c5_149, %c0_150, %c0_151] : memref<6x32x32xf32, #tpu.memory_space<vmem>>, vector<1x32x32xf32>
    %166 = vector.shape_cast %165 : vector<1x32x32xf32> to vector<32x32xf32>
    %cst_152 = arith.constant dense<0.000000e+00> : vector<2x32xf32>
    %167 = tpu.matmul %150, %166, %cst_152 {dimension_numbers = #tpu.dot_dimension_numbers<[1], [0], [0], [1], [0, 0, 1, 1], [], []>} : vector<2x32xf32>, vector<32x32xf32>, vector<2x32xf32> -> vector<2x32xf32>
    %168 = arith.addf %164, %167 : vector<2x32xf32>
    %c5_153 = arith.constant 5 : index
    %c0_154 = arith.constant 0 : index
    %c0_155 = arith.constant 0 : index
    %169 = vector.load %arg3[%c5_153, %c0_154, %c0_155] : memref<6x4x32xf32, #tpu.memory_space<vmem>>, vector<1x4x32xf32>
    %170 = vector.shape_cast %169 : vector<1x4x32xf32> to vector<4x32xf32>
    %cst_156 = arith.constant dense<0.000000e+00> : vector<2x32xf32>
    %171 = tpu.matmul %157, %170, %cst_156 {dimension_numbers = #tpu.dot_dimension_numbers<[1], [0], [0], [1], [0, 0, 1, 1], [], []>} : vector<2x4xf32>, vector<4x32xf32>, vector<2x32xf32> -> vector<2x32xf32>
    %172 = arith.addf %168, %171 : vector<2x32xf32>
    %cst_157 = arith.constant 0.000000e+00 : f32
    %173 = vector.broadcast %cst_157 : f32 to vector<2x32xf32>
    %174 = arith.maximumf %172, %173 : vector<2x32xf32>
    %c5_158 = arith.constant 5 : index
    %c0_159 = arith.constant 0 : index
    %c0_160 = arith.constant 0 : index
    %175 = vector.load %arg5[%c5_158, %c0_159, %c0_160] : memref<6x32x32xf32, #tpu.memory_space<vmem>>, vector<1x32x32xf32>
    %176 = vector.shape_cast %175 : vector<1x32x32xf32> to vector<32x32xf32>
    %cst_161 = arith.constant dense<0.000000e+00> : vector<2x32xf32>
    %177 = tpu.matmul %174, %176, %cst_161 {dimension_numbers = #tpu.dot_dimension_numbers<[1], [0], [0], [1], [0, 0, 1, 1], [], []>} : vector<2x32xf32>, vector<32x32xf32>, vector<2x32xf32> -> vector<2x32xf32>
    %c5_162 = arith.constant 5 : index
    %c0_163 = arith.constant 0 : index
    %c0_164 = arith.constant 0 : index
    %178 = vector.load %arg6[%c5_162, %c0_163, %c0_164] : memref<6x1x32xf32, #tpu.memory_space<vmem>>, vector<1x1x32xf32>
    %179 = vector.shape_cast %178 : vector<1x1x32xf32> to vector<1x32xf32>
    %180 = vector.broadcast %179 : vector<1x32xf32> to vector<2x32xf32>
    %181 = arith.addf %177, %180 : vector<2x32xf32>
    %cst_165 = arith.constant 0.000000e+00 : f32
    %182 = vector.broadcast %cst_165 : f32 to vector<2x32xf32>
    %183 = arith.maximumf %181, %182 : vector<2x32xf32>
    %c5_166 = arith.constant 5 : index
    %c0_167 = arith.constant 0 : index
    %c0_168 = arith.constant 0 : index
    %184 = vector.load %arg7[%c5_166, %c0_167, %c0_168] : memref<6x32x4xf32, #tpu.memory_space<vmem>>, vector<1x32x4xf32>
    %185 = vector.shape_cast %184 : vector<1x32x4xf32> to vector<32x4xf32>
    %cst_169 = arith.constant dense<0.000000e+00> : vector<2x4xf32>
    %186 = tpu.matmul %183, %185, %cst_169 {dimension_numbers = #tpu.dot_dimension_numbers<[1], [0], [0], [1], [0, 0, 1, 1], [], []>} : vector<2x32xf32>, vector<32x4xf32>, vector<2x4xf32> -> vector<2x4xf32>
    %c5_170 = arith.constant 5 : index
    %c0_171 = arith.constant 0 : index
    %c0_172 = arith.constant 0 : index
    %187 = vector.load %arg8[%c5_170, %c0_171, %c0_172] : memref<6x1x4xf32, #tpu.memory_space<vmem>>, vector<1x1x4xf32>
    %188 = vector.shape_cast %187 : vector<1x1x4xf32> to vector<1x4xf32>
    %189 = vector.broadcast %188 : vector<1x4xf32> to vector<2x4xf32>
    %190 = arith.addf %186, %189 : vector<2x4xf32>
    %191 = tpu.concatenate %25, %58, %91, %124, %157, %190 in 1 : vector<2x4xf32>, vector<2x4xf32>, vector<2x4xf32>, vector<2x4xf32>, vector<2x4xf32>, vector<2x4xf32> -> vector<2x24xf32>
    %c0_173 = arith.constant 0 : index
    %c0_174 = arith.constant 0 : index
    %192 = vector.load %arg9[%c0_173, %c0_174] : memref<2x24xf32, #tpu.memory_space<vmem>>, vector<2x24xf32>
    tpu.vector_store %arg9[%c0_173, %c0_174], %191 {strides = array<i32>} : memref<2x24xf32, #tpu.memory_space<vmem>>, vector<2x24xf32>,
    return
  }
}

</mosaic_0001>

<bundles_post_ra>
// kernel: tpu_custom_call.1
= control target key start
LH: loop header
LB: loop body
LE: loop exit
PB: predicated region body
PF: predicated region fallthrough
CT: control target
= control target key end

     0   :  { %14 = vsyncpa [#allocation3], 0  ;;  %s1544_s0 = inlined_call_operand.hbm [shape: f32[2,32], index: 0, kind: input, shape index: {}]   ;;  %s1545_s1 = inlined_call_operand.vmem [shape: f32[6,32,32], index: 1, kind: input, shape index: {}]   ;;  %s1546_s2 = inlined_call_operand.hbm [shape: f32[6,32,32], index: 2, kind: input, shape index: {}]   ;;  %s1547_s3 = inlined_call_operand.vmem [shape: f32[6,4,32], index: 3, kind: input, shape index: {}]   ;;  %s1548_s4 = inlined_call_operand.vmem [shape: f32[6,1,32], index: 4, kind: input, shape index: {}]   ;;  %s1549_s5 = inlined_call_operand.hbm [shape: f32[6,32,32], index: 5, kind: input, shape index: {}]   ;;  %s1550_s6 = inlined_call_operand.vmem [shape: f32[6,1,32], index: 6, kind: input, shape index: {}]   ;;  %s1551_s7 = inlined_call_operand.vmem [shape: f32[6,32,4], index: 7, kind: input, shape index: {}]   ;;  %s1552_s8 = inlined_call_operand.vmem [shape: f32[6,1,4], index: 8, kind: input, shape index: {}]   ;;  %s1553_s9 = inlined_call_operand.hbm [shape: f32[2,24], index: 9, kind: output, shape index: {}]  }
   0x1   :  { %15 = vsyncpa [#allocation6], 0  ;;  %s34_s11 = sshll.u32 %s1546_s2, 4  ;;  %s35_s11 = int_to_ptr.hbm [resolvable:$true] %s34_s11 }
   0x2   :  { %16 = vsyncpa [#allocation4], 0  ;;  %s1210_s12 = smov [#allocation5]   ;;  %s22_s16 = sshll.u32 %s1544_s0, 4  ;;  %s23_s16 = int_to_ptr.hbm [resolvable:$true] %s22_s16 }
   0x3   :  { %s36_s13 = sshll.u32 %s1210_s12, 4  ;;  %s1211_s17 = smov 128   ;;  %s37_s13 = int_to_ptr.vmem [resolvable:$true] %s36_s13 }
   0x4   :  { %s1212_s18 = smov 8   ;;  %s1213_s19 = smov [#allocation2]  }
   0x5   :  { %42 = dma.hbm_to_vmem [thread:$0]  %s35_s11, 3072, %s37_s13, [#allocation6], %s1211_s17, %s1211_s17, %s1212_s18  }
   0x6   :  { %s24_s20 = sshll.u32 %s1213_s19, 4  ;;  %s51_s2 = sshll.u32 %s1549_s5, 4  ;;  %s25_s20 = int_to_ptr.vmem [resolvable:$true] %s24_s20  ;;  %s52_s2 = int_to_ptr.hbm [resolvable:$true] %s51_s2 }
   0x7   :  { %27 = dma.hbm_to_vmem [thread:$0]  %s23_s16, 32, %s25_s20, [#allocation3]  }
   0x8   :  { %s1214_s23 = smov [#allocation7]  }
   0x9   :  { %s53_s24 = sshll.u32 %s1214_s23, 4  ;;  %s54_s24 = int_to_ptr.vmem [resolvable:$true] %s53_s24 }
   0xa   :  { %59 = dma.hbm_to_vmem [thread:$0]  %s52_s2, 3072, %s54_s24, [#allocation6], %s1211_s17, %s1211_s17, %s1212_s18  }
   0xb   :  { %1204 = dma.done.wait [#allocation3], 32  }
   0xc   :  { %1205 = vsyncadd [#allocation3], 4294967264 }
   0xd   :  { %1206 = dma.done.wait [#allocation6], 6144  }
   0xe   :  { %1207 = vsyncadd [#allocation6], 4294961152  ;;  %v82_v0 = vld [vmem:[%s1545_s1 + $0x18] sm:$0xff]  ;;  %v81_v1 = vld [vmem:[%s1545_s1 + $0x10] sm:$0xff]  ;;  %vm87_vm0 = vcmask 261120   ;;  %vm237_vm1 = vcmask 1043456  }
   0xf   :  { %103 = vmatpush.msra.mxu0 %v82_v0  ;;  %v80_v2 = vld [vmem:[%s1545_s1 + $0x8] sm:$0xff]  ;;  %v115_v3 = vld [vmem:[#allocation7 + $0x18] sm:$0xff]  ;;  %v114_v6 = vld [vmem:[#allocation7 + $0x10] sm:$0xff]  ;;  %vm233_vm2 = vcmask 31744   ;;  %s1215_s12 = smov 4   ;;  %s1216_s14 = smov 12  }
  0x10   :  { %v79_v4 = vld [vmem:[%s1545_s1] sm:$0xff]  ;;  %135 = vmatpush.msra.mxu1 %v115_v3  ;;  %v113_v7 = vld [vmem:[#allocation7 + $0x8] sm:$0xff]  ;;  %v993_v9 = vld [vmem:[%s1545_s1 + $0x38] sm:$0xff]  ;;  %s1218_s25 = smov 20   ;;  %vm959_vm3 = vcmask 64512   ;;  %vm961_vm4 = vcmask 97280  }
  0x11   :  { %104 = vmatpush.msra.mxu0 %v81_v1  ;;  %v1293_v5 = vld [vmem:[#allocation2] sm:$0x3]  ;;  %v112_v8 = vld [vmem:[#allocation7] sm:$0xff]  ;;  %v992_v10 = vld [vmem:[%s1545_s1 + $0x30] sm:$0xff]  ;;  %197 = vmatpush.msra.mxu3 %v993_v9  ;;  %vm963_vm5 = vcmask 130048   ;;  %vm965_vm6 = vcmask 162816  }
  0x12   :  { %136 = vmatpush.msra.mxu1 %v114_v6  ;;  %v147_v11 = vld [vmem:[%s1551_s7 + $0x18] sm:$0xff]  ;;  %v991_v13 = vld [vmem:[%s1545_s1 + $0x28] sm:$0xff]  ;;  %v990_v14 = vld [vmem:[%s1545_s1 + $0x20] sm:$0xff]  ;;  %vm967_vm7 = vcmask 189440  }
  0x13   :  { %105 = vmatpush.msra.mxu0 %v80_v2  ;;  %v209_v12 = vld [vmem:[#allocation5 + $0x38] sm:$0xff]  ;;  %167 = vmatpush.msra.mxu2 %v147_v11  ;;  %v146_v19 = vld [vmem:[%s1551_s7 + $0x10] sm:$0xff]  ;;  %v145_v21 = vld [vmem:[%s1551_s7 + $0x8] sm:$0xff] }
  0x14   :  { %137 = vmatpush.msra.mxu1 %v113_v7  ;;  %198 = vmatpush.msra.mxu3 %v992_v10  ;;  %v1090_v15 = vld [vmem:[%s1548_s4] ss:$0 sm:$0xff]  ;;  %v208_v20 = vld [vmem:[#allocation5 + $0x30] sm:$0xff]  ;;  %v207_v22 = vld [vmem:[#allocation5 + $0x28] sm:$0xff] }
  0x15   :  { %106 = vmatpush.msra.mxu0 %v79_v4  ;;  %168 = vmatpush.msra.mxu2 %v146_v19  ;;  %v144_v23 = vld [vmem:[%s1551_s7] sm:$0xff]  ;;  %v266_v31 = vld [vmem:[#allocation7 + $0x30] sm:$0xff]  ;;  %v265_v35 = vld [vmem:[#allocation7 + $0x28] sm:$0xff] }
  0x16   :  { %987 = vmatmul.msk.f32.vlgmr.msra.gmra.mxu0 %vm87_vm0, %v1293_v5  ;;  %138 = vmatpush.msra.mxu1 %v112_v8  ;;  %v206_v24 = vld [vmem:[#allocation5 + $0x20] sm:$0xff]  ;;  %v1091_v25 = vld [vmem:[%s1550_s6] ss:$0 sm:$0xff]  ;;  %v1011_v37 = vld [vmem:[%s1545_s1 + $0x58] sm:$0xff] }
  0x17   :  { %222 = vmatpush.msrb.mxu0 %v209_v12  ;;  %199 = vmatpush.msra.mxu3 %v991_v13  ;;  %v997_v29 = vld [vmem:[%s1547_s3 + $0x4] sm:$0xf]  ;;  %v267_v30 = vld [vmem:[#allocation7 + $0x38] sm:$0xff]  ;;  %v1010_v39 = vld [vmem:[%s1545_s1 + $0x50] sm:$0xff] }
  0x18   :  { %169 = vmatpush.msra.mxu2 %v145_v21  ;;  %998 = vmatpush.msk.msrb.mxu1 %vm237_vm1, %v997_v29  ;;  %v1093_v32 = vld [vmem:[%s1552_s8] ss:$0 sm:$0xff]  ;;  %v264_v36 = vld [vmem:[#allocation7 + $0x20] sm:$0xff]  ;;  %v1005_v38 = vld [vmem:[%s1551_s7 + $0x38] sm:$0xff] }
  0x19   :  { %200 = vmatpush.msra.mxu3 %v990_v14  ;;  %223 = vmatpush.msrb.mxu0 %v208_v20  ;;  %v364_v40 = vld [vmem:[#allocation5 + $0x58] sm:$0xff]  ;;  %v1004_v41 = vld [vmem:[%s1551_s7 + $0x30] sm:$0xff]  ;;  %v1009_v50 = vld [vmem:[%s1545_s1 + $0x48] sm:$0xff] }
  0x1a   :  { %995 = vmatmul.msk.f32.vlgmr.msra.gmra.mxu3 %vm87_vm0, %v1293_v5  ;;  %170 = vmatpush.msra.mxu2 %v144_v23  ;;  %v1092_v42 = vld [vmem:[%s1548_s4 + $0x1] ss:$0 sm:$0xff]  ;;  %v363_v51 = vld [vmem:[#allocation5 + $0x50] sm:$0xff]  ;;  %v1003_v52 = vld [vmem:[%s1551_s7 + $0x28] sm:$0xff] }
  0x1b   :  { %224 = vmatpush.msrb.mxu0 %v207_v22  ;;  %322 = vmatpush.msrb.mxu3 %v1005_v38  ;;  %v1008_v53 = vld [vmem:[%s1545_s1 + $0x40] sm:$0xff]  ;;  %v362_v54 = vld [vmem:[#allocation5 + $0x48] sm:$0xff]  ;;  %v419_v2 = vld [vmem:[#allocation7 + $0x50] sm:$0xff] }
  0x1c   :  { %288 = vmatpush.msrb.mxu2 %v267_v30  ;;  %v1002_v55 = vld [vmem:[%s1551_s7 + $0x20] sm:$0xff]  ;;  %v1015_v61 = vld [vmem:[%s1547_s3 + $0x8] sm:$0xf]  ;;  %v1023_v6 = vld [vmem:[%s1551_s7 + $0x58] sm:$0xff] }
  0x1d   :  { %225 = vmatpush.msrb.mxu0 %v206_v24  ;;  %323 = vmatpush.msrb.mxu3 %v1004_v41  ;;  %v361_v56 = vld [vmem:[#allocation5 + $0x40] sm:$0xff]  ;;  %v1094_v57 = vld [vmem:[%s1550_s6 + $0x1] ss:$0 sm:$0xff]  ;;  %v418_v3 = vld [vmem:[#allocation7 + $0x48] sm:$0xff] }
  0x1e   :  { %289 = vmatpush.msrb.mxu2 %v266_v31  ;;  %v1096_v62 = vld [vmem:[%s1552_s8 + $0x1] ss:$0 sm:$0xff]  ;;  %v417_v4 = vld [vmem:[#allocation7 + $0x40] sm:$0xff]  ;;  %v1022_v8 = vld [vmem:[%s1551_s7 + $0x50] sm:$0xff] }
  0x1f   :  { %352 = vmatpush.msra.mxu0 %v1011_v37  ;;  %324 = vmatpush.msrb.mxu3 %v1003_v52  ;;  %v420_v1 = vld [vmem:[#allocation7 + $0x58] sm:$0xff]  ;;  %v1095_v9 = vld [vmem:[%s1548_s4 + $0x2] ss:$0 sm:$0xff]  ;;  %v515_v20 = vld [vmem:[#allocation5 + $0x68] sm:$0xff] }
  0x20   :  { %290 = vmatpush.msrb.mxu2 %v265_v35  ;;  %v517_v7 = vld [vmem:[#allocation5 + $0x78] sm:$0xff]  ;;  %v1028_v22 = vld [vmem:[%s1545_s1 + $0x70] sm:$0xff]  ;;  %v514_v23 = vld [vmem:[#allocation5 + $0x60] sm:$0xff] }
  0x21   :  { %353 = vmatpush.msra.mxu0 %v1010_v39  ;;  %325 = vmatpush.msrb.mxu3 %v1002_v55  ;;  %v1029_v19 = vld [vmem:[%s1545_s1 + $0x78] sm:$0xff]  ;;  %v1020_v21 = vld [vmem:[%s1551_s7 + $0x40] sm:$0xff]  ;;  %v1027_v24 = vld [vmem:[%s1545_s1 + $0x68] sm:$0xff] }
  0x22   :  { %291 = vmatpush.msrb.mxu2 %v264_v36  ;;  %v1098_v31 = vld [vmem:[%s1552_s8 + $0x2] ss:$0 sm:$0xff]  ;;  %v573_v35 = vld [vmem:[#allocation7 + $0x78] sm:$0xff]  ;;  %v572_v36 = vld [vmem:[#allocation7 + $0x70] sm:$0xff] }
  0x23   :  { %354 = vmatpush.msra.mxu0 %v1009_v50  ;;  %441 = vmatpush.msra.mxu3 %v420_v1  ;;  %v571_v37 = vld [vmem:[#allocation7 + $0x68] sm:$0xff]  ;;  %v570_v38 = vld [vmem:[#allocation7 + $0x60] sm:$0xff]  ;;  %v1047_v39 = vld [vmem:[%s1545_s1 + $0x98] sm:$0xff] }
  0x24   :  { %v1046_v41 = vld [vmem:[%s1545_s1 + $0x90] sm:$0xff]  ;;  %v1045_v52 = vld [vmem:[%s1545_s1 + $0x88] sm:$0xff]  ;;  %v1044_v55 = vld [vmem:[%s1545_s1 + $0x80] sm:$0xff] }
  0x25   :  { %355 = vmatpush.msra.mxu0 %v1008_v53  ;;  %442 = vmatpush.msra.mxu3 %v419_v2  ;;  %v669_v53 = vld [vmem:[#allocation5 + $0x90] sm:$0xff] }
  0x27   :  { %443 = vmatpush.msra.mxu3 %v418_v3  ;;  %v726_v3 = vld [vmem:[#allocation7 + $0x98] sm:$0xff] }
  0x29   :  { %444 = vmatpush.msra.mxu3 %v417_v4  ;;  %v725_v4 = vld [vmem:[#allocation7 + $0x90] sm:$0xff] }
  0x93   :  { %v108_v16 = vpop.f32.mrf.mxu0 }
  0x94   :  { %v109_v17 = vadd.f32 %v1090_v15, %v108_v16 }
  0x96   :  { %v111_v18 = vmax.f32 %v109_v17, 0.0  ;;  %v516_v17 = vld [vmem:[#allocation5 + $0x70] sm:$0xff] }
  0x98   :  { %988 = vmatmul.msk.f32.vlgmr.msra.gmra.mxu1 %vm87_vm0, %v111_v18  ;;  %v1021_v18 = vld [vmem:[%s1551_s7 + $0x48] sm:$0xff] }
  0x99   :  { %377 = vmatpush.msra.mxu1 %v364_v40  ;;  %v1041_v40 = vld [vmem:[%s1551_s7 + $0x78] sm:$0xff] }
  0x9b   :  { %378 = vmatpush.msra.mxu1 %v363_v51 }
  0x9d   :  { %v202_v43 = vpop.f32.mrf.mxu3  ;;  %379 = vmatpush.msra.mxu1 %v362_v54  ;;  %v1039_v54 = vld [vmem:[%s1551_s7 + $0x68] sm:$0xff] }
  0x9e   :  { %v203_v44 = vadd.f32 %v1092_v42, %v202_v43  ;;  %v670_v42 = vld [vmem:[#allocation5 + $0x98] sm:$0xff]  ;;  %v1040_v43 = vld [vmem:[%s1551_s7 + $0x70] sm:$0xff] }
  0x9f   :  { %380 = vmatpush.msra.mxu1 %v361_v56  ;;  %v668_v56 = vld [vmem:[#allocation5 + $0x88] sm:$0xff] }
 0x115   :  { %v140_v26 = vpop.f32.mrf.mxu1 }
 0x116   :  { %v141_v27 = vadd.f32 %v1091_v25, %v140_v26  ;;  %v1026_v25 = vld [vmem:[%s1545_s1 + $0x60] sm:$0xff]  ;;  %v1033_v26 = vld [vmem:[%s1547_s3 + $0xc] sm:$0xf] }
 0x118   :  { %v143_v28 = vmax.f32 %v141_v27, 0.0  ;;  %v1097_v27 = vld [vmem:[%s1550_s6 + $0x2] ss:$0 sm:$0xff] }
 0x11a   :  { %989 = vmatmul.msk.f32.vlgmr.msra.gmra.mxu2 %vm87_vm0, %v143_v28  ;;  %996 = vmatmul.msk.f32.vlgmr.msrb.gmra.mxu0 %vm87_vm0, %v143_v28 }
 0x11b   :  { %1016 = vmatpush.msk.msra.mxu2 %vm237_vm1, %v1015_v61  ;;  %475 = vmatpush.msrb.mxu0 %v1023_v6  ;;  %v724_v6 = vld [vmem:[#allocation7 + $0x88] sm:$0xff] }
 0x11d   :  { %476 = vmatpush.msrb.mxu0 %v1022_v8  ;;  %v1065_v8 = vld [vmem:[%s1545_s1 + $0xb8] sm:$0xff] }
 0x11f   :  { %477 = vmatpush.msrb.mxu0 %v1021_v18 }
 0x121   :  { %478 = vmatpush.msrb.mxu0 %v1020_v21 }
 0x122   :  { %1013 = vmatmul.msk.f32.vlgmr.msra.gmra.mxu0 %vm87_vm0, %v1293_v5 }
 0x123   :  { %594 = vmatpush.msra.mxu0 %v573_v35 }
 0x125   :  { %595 = vmatpush.msra.mxu0 %v572_v36  ;;  %v879_v36 = vld [vmem:[#allocation7 + $0xb8] sm:$0xff] }
 0x127   :  { %596 = vmatpush.msra.mxu0 %v571_v37  ;;  %v878_v37 = vld [vmem:[#allocation7 + $0xb0] sm:$0xff] }
 0x129   :  { %597 = vmatpush.msra.mxu0 %v570_v38  ;;  %v877_v38 = vld [vmem:[#allocation7 + $0xa8] sm:$0xff] }
 0x197   :  { %v227_v45 = vpop.f32.mrf.mxu0 }
 0x198   :  { %v230_v46 = vadd.f32 %v227_v45, %v203_v44  ;;  %v1099_v44 = vld [vmem:[%s1548_s4 + $0x3] ss:$0 sm:$0xff] }
 0x19d   :  { %v172_v33 = vpop.f32.mrf.mxu2 }
 0x19e   :  { %v1339_v34 = vadd.f32 %v1093_v32, %v172_v33 }
 0x19f   :  { %v357_v10 = vpop.f32.mrf.mxu0 }
 0x1a0   :  { %999 = vmatmul.msk.f32.vlgmr.msrb.gmra.mxu1 %vm233_vm2, %v1339_v34  ;;  %v358_v11 = vadd.f32 %v1095_v9, %v357_v10  ;;  %v1064_v9 = vld [vmem:[%s1545_s1 + $0xb0] sm:$0xff]  ;;  %v1059_v10 = vld [vmem:[%s1551_s7 + $0x98] sm:$0xff] }
 0x1a1   :  { %505 = vmatpush.msrb.mxu1 %v1029_v19 }
 0x1a3   :  { %506 = vmatpush.msrb.mxu1 %v1028_v22 }
 0x1a5   :  { %507 = vmatpush.msrb.mxu1 %v1027_v24  ;;  %v1057_v24 = vld [vmem:[%s1551_s7 + $0x88] sm:$0xff] }
 0x1a7   :  { %508 = vmatpush.msrb.mxu1 %v1026_v25  ;;  %v1056_v25 = vld [vmem:[%s1551_s7 + $0x80] sm:$0xff] }
 0x21d   :  { %v258_v47 = vpop.f32.mrf.mxu1 }
 0x21e   :  { %v261_v48 = vadd.f32 %v258_v47, %v230_v46 }
 0x220   :  { %v262_v49 = vmax.f32 %v261_v48, 0.0 }
 0x222   :  { %1001 = vmatmul.msk.f32.vlgmr.msrb.gmra.mxu2 %vm87_vm0, %v262_v49 }
 0x223   :  { %530 = vmatpush.msrb.mxu2 %v517_v7  ;;  %v723_v7 = vld [vmem:[#allocation7 + $0x80] sm:$0xff] }
 0x225   :  { %531 = vmatpush.msrb.mxu2 %v516_v17 }
 0x227   :  { %532 = vmatpush.msrb.mxu2 %v515_v20 }
 0x229   :  { %533 = vmatpush.msrb.mxu2 %v514_v23  ;;  %v822_v23 = vld [vmem:[#allocation5 + $0xb0] sm:$0xff] }
 0x2a5   :  { %v293_v58 = vpop.f32.mrf.mxu2 }
 0x2a6   :  { %v294_v59 = vadd.f32 %v1094_v57, %v293_v58  ;;  %v1038_v57 = vld [vmem:[%s1551_s7 + $0x60] sm:$0xff] }
 0x2a7   :  { %v667_v58 = vld [vmem:[#allocation5 + $0x80] sm:$0xff] }
 0x2a8   :  { %v296_v60 = vmax.f32 %v294_v59, 0.0  ;;  %v1051_v59 = vld [vmem:[%s1547_s3 + $0x10] sm:$0xf] }
 0x2aa   :  { %1007 = vmatmul.msk.f32.vlgmr.msrb.gmra.mxu3 %vm87_vm0, %v296_v60  ;;  %1014 = vmatmul.msk.f32.vlgmr.msra.gmra.mxu1 %vm87_vm0, %v296_v60  ;;  %v1100_v60 = vld [vmem:[%s1550_s6 + $0x3] ss:$0 sm:$0xff] }
 0x2ab   :  { %1034 = vmatpush.msk.msrb.mxu3 %vm237_vm1, %v1033_v26  ;;  %628 = vmatpush.msra.mxu1 %v1041_v40  ;;  %v820_v26 = vld [vmem:[#allocation5 + $0xa0] sm:$0xff]  ;;  %v1077_v40 = vld [vmem:[%s1551_s7 + $0xb8] sm:$0xff] }
 0x2ad   :  { %629 = vmatpush.msra.mxu1 %v1040_v43 }
 0x2af   :  { %630 = vmatpush.msra.mxu1 %v1039_v54 }
 0x2b1   :  { %631 = vmatpush.msra.mxu1 %v1038_v57 }
 0x2b2   :  { %1031 = vmatmul.msk.f32.vlgmr.msrb.gmra.mxu1 %vm87_vm0, %v1293_v5 }
 0x2b3   :  { %747 = vmatpush.msrb.mxu1 %v726_v3 }
 0x2b5   :  { %748 = vmatpush.msrb.mxu1 %v725_v4 }
 0x2b7   :  { %749 = vmatpush.msrb.mxu1 %v724_v6 }
 0x2b9   :  { %750 = vmatpush.msrb.mxu1 %v723_v7 }
 0x327   :  { %v382_v12 = vpop.f32.mrf.mxu1 }
 0x328   :  { %v385_v13 = vadd.f32 %v382_v12, %v358_v11  ;;  %v823_v11 = vld [vmem:[#allocation5 + $0xb8] sm:$0xff]  ;;  %v1063_v12 = vld [vmem:[%s1545_s1 + $0xa8] sm:$0xff] }
 0x32d   :  { %v327_v63 = vpop.f32.mrf.mxu3 }
 0x32e   :  { %v328_v0 = vadd.f32 %v1096_v62, %v327_v63 }
 0x32f   :  { %v510_v45 = vpop.f32.mrf.mxu1 }
 0x330   :  { %942 = vrot.lane.b32.xlu0 %v328_v0, %s1215_s12  ;;  %1017 = vmatmul.msk.f32.vlgmr.msra.gmra.mxu2 %vm233_vm2, %v328_v0  ;;  %v511_v46 = vadd.f32 %v1099_v44, %v510_v45  ;;  %v1101_v0 = vld [vmem:[%s1552_s8 + $0x3] ss:$0 sm:$0xff] }
 0x331   :  { %658 = vmatpush.msra.mxu2 %v1047_v39  ;;  %v876_v39 = vld [vmem:[#allocation7 + $0xa0] sm:$0xff] }
 0x333   :  { %659 = vmatpush.msra.mxu2 %v1046_v41  ;;  %v1076_v41 = vld [vmem:[%s1551_s7 + $0xb0] sm:$0xff] }
 0x335   :  { %660 = vmatpush.msra.mxu2 %v1045_v52  ;;  %v1106_v52 = vld [vmem:[%s1550_s6 + $0x5] ss:$0 sm:$0xff] }
 0x337   :  { %661 = vmatpush.msra.mxu2 %v1044_v55 }
 0x3b3   :  { %v411_v14 = vpop.f32.mrf.mxu2 }
 0x3b4   :  { %v414_v15 = vadd.f32 %v411_v14, %v385_v13  ;;  %v1058_v13 = vld [vmem:[%s1551_s7 + $0x90] sm:$0xff]  ;;  %v1062_v14 = vld [vmem:[%s1545_s1 + $0xa0] sm:$0xff] }
 0x3b6   :  { %v415_v16 = vmax.f32 %v414_v15, 0.0  ;;  %v1102_v15 = vld [vmem:[%s1548_s4 + $0x4] ss:$0 sm:$0xff] }
 0x3b8   :  { %1019 = vmatmul.msk.f32.vlgmr.msra.gmra.mxu3 %vm87_vm0, %v415_v16 }
 0x3b9   :  { %683 = vmatpush.msra.mxu3 %v670_v42  ;;  %v1104_v42 = vld [vmem:[%s1548_s4 + $0x5] ss:$0 sm:$0xff] }
 0x3bb   :  { %684 = vmatpush.msra.mxu3 %v669_v53 }
 0x3bd   :  { %685 = vmatpush.msra.mxu3 %v668_v56  ;;  %v1107_v56 = vld [vmem:[%s1552_s8 + $0x5] ss:$0 sm:$0xff] }
 0x3bf   :  { %686 = vmatpush.msra.mxu3 %v667_v58 }
 0x43b   :  { %v446_v28 = vpop.f32.mrf.mxu3 }
 0x43c   :  { %v447_v29 = vadd.f32 %v1097_v27, %v446_v28  ;;  %v1103_v27 = vld [vmem:[%s1550_s6 + $0x4] ss:$0 sm:$0xff]  ;;  %s1219_s6 = smov [#allocation8]  }
 0x43e   :  { %v449_v30 = vmax.f32 %v447_v29, 0.0 }
 0x440   :  { %1025 = vmatmul.msk.f32.vlgmr.msrb.gmra.mxu0 %vm87_vm0, %v449_v30  ;;  %1032 = vmatmul.msk.f32.vlgmr.msrb.gmra.mxu2 %vm87_vm0, %v449_v30 }
 0x441   :  { %1052 = vmatpush.msk.msrb.mxu0 %vm237_vm1, %v1051_v59  ;;  %781 = vmatpush.msrb.mxu2 %v1059_v10  ;;  %v943_v59 = vpop.permute.xlu0 %942 }
 0x443   :  { %782 = vmatpush.msrb.mxu2 %v1058_v13 }
 0x445   :  { %783 = vmatpush.msrb.mxu2 %v1057_v24 }
 0x447   :  { %784 = vmatpush.msrb.mxu2 %v1056_v25 }
 0x448   :  { %1049 = vmatmul.msk.f32.vlgmr.msra.gmra.mxu2 %vm87_vm0, %v1293_v5 }
 0x449   :  { %900 = vmatpush.msra.mxu2 %v879_v36 }
 0x44b   :  { %901 = vmatpush.msra.mxu2 %v878_v37 }
 0x44d   :  { %902 = vmatpush.msra.mxu2 %v877_v38 }
 0x44f   :  { %903 = vmatpush.msra.mxu2 %v876_v39 }
 0x4bd   :  { %v480_v32 = vpop.f32.mrf.mxu0 }
 0x4be   :  { %v481_v33 = vadd.f32 %v1098_v31, %v480_v32  ;;  %v1069_v31 = vld [vmem:[%s1547_s3 + $0x14] sm:$0xf]  ;;  %v1105_v32 = vld [vmem:[%s1552_s8 + $0x4] ss:$0 sm:$0xff]  ;;  %s976_s8 = sshll.u32 %s1553_s9, 4  ;;  %s977_s8 = int_to_ptr.hbm [resolvable:$true] %s976_s8 }
 0x4c0   :  { %945 = vrot.lane.b32.xlu0 %v481_v33, %s1212_s18  ;;  %1035 = vmatmul.msk.f32.vlgmr.msrb.gmra.mxu3 %vm233_vm2, %v481_v33 }
 0x4c1   :  { %811 = vmatpush.msrb.mxu3 %v1065_v8 }
 0x4c3   :  { %v535_v47 = vpop.f32.mrf.mxu2  ;;  %812 = vmatpush.msrb.mxu3 %v1064_v9 }
 0x4c4   :  { %v538_v48 = vadd.f32 %v535_v47, %v511_v46 }
 0x4c5   :  { %813 = vmatpush.msrb.mxu3 %v1063_v12 }
 0x4c7   :  { %814 = vmatpush.msrb.mxu3 %v1062_v14 }
 0x4cb   :  { %v663_v16 = vpop.f32.mrf.mxu2 }
 0x4cc   :  { %v664_v17 = vadd.f32 %v1102_v15, %v663_v16 }
 0x543   :  { %v564_v49 = vpop.f32.mrf.mxu3 }
 0x544   :  { %v567_v50 = vadd.f32 %v564_v49, %v538_v48 }
 0x546   :  { %v568_v51 = vmax.f32 %v567_v50, 0.0  ;;  %v1075_v50 = vld [vmem:[%s1551_s7 + $0xa8] sm:$0xff] }
 0x548   :  { %1037 = vmatmul.msk.f32.vlgmr.msra.gmra.mxu0 %vm87_vm0, %v568_v51  ;;  %v1074_v51 = vld [vmem:[%s1551_s7 + $0xa0] sm:$0xff]  ;;  %s974_s7 = sshll.u32 %s1219_s6, 4  ;;  %s975_s7 = int_to_ptr.vmem [resolvable:$true] %s974_s7 }
 0x549   :  { %836 = vmatpush.msra.mxu0 %v823_v11 }
 0x54b   :  { %837 = vmatpush.msra.mxu0 %v822_v23 }
 0x5c5   :  { %v599_v61 = vpop.f32.mrf.mxu0 }
 0x5c6   :  { %v600_v62 = vadd.f32 %v1100_v60, %v599_v61  ;;  %v946_v61 = vpop.permute.xlu0 %945 }
 0x5c8   :  { %v602_v63 = vmax.f32 %v600_v62, 0.0  ;;  %v958_v62 = vsel %vm233_vm2, %v1339_v34, %v943_v59 }
 0x5ca   :  { %1043 = vmatmul.msk.f32.vlgmr.msra.gmra.mxu1 %vm87_vm0, %v602_v63  ;;  %1050 = vmatmul.msk.f32.vlgmr.msra.gmra.mxu3 %vm87_vm0, %v602_v63 }
 0x5cb   :  { %1070 = vmatpush.msk.msra.mxu1 %vm237_vm1, %v1069_v31  ;;  %934 = vmatpush.msra.mxu3 %v1077_v40 }
 0x5cd   :  { %935 = vmatpush.msra.mxu3 %v1076_v41 }
 0x5cf   :  { %936 = vmatpush.msra.mxu3 %v1075_v50 }
 0x5d1   :  { %937 = vmatpush.msra.mxu3 %v1074_v51 }
 0x5d2   :  { %1067 = vmatmul.msk.f32.vlgmr.msrb.gmra.mxu3 %vm87_vm0, %v1293_v5  ;;  %v821_v5 = vld [vmem:[#allocation5 + $0xa8] sm:$0xff] }
 0x5d3   :  { %838 = vmatpush.msra.mxu0 %v821_v5 }
 0x5d5   :  { %839 = vmatpush.msra.mxu0 %v820_v26 }
 0x647   :  { %v633_v1 = vpop.f32.mrf.mxu1 }
 0x648   :  { %v634_v2 = vadd.f32 %v1101_v0, %v633_v1  ;;  %v960_v0 = vsel %vm959_vm3, %v958_v62, %v946_v61 }
 0x64a   :  { %948 = vrot.lane.b32.xlu1 %v634_v2, %s1216_s14  ;;  %1053 = vmatmul.msk.f32.vlgmr.msrb.gmra.mxu0 %vm233_vm2, %v634_v2  ;;  %s1217_s14 = smov 16  }
 0x64d   :  { %v688_v18 = vpop.f32.mrf.mxu3 }
 0x64e   :  { %v691_v19 = vadd.f32 %v688_v18, %v664_v17 }
 0x655   :  { %v816_v43 = vpop.f32.mrf.mxu3 }
 0x656   :  { %v817_v44 = vadd.f32 %v1104_v42, %v816_v43 }
 0x6bc   :  { %v949_v60 = vpop.permute.xlu1 %948 }
 0x6bd   :  { %v962_v1 = vsel %vm961_vm4, %v960_v0, %v949_v60 }
 0x6c7   :  { %v717_v20 = vpop.f32.mrf.mxu0 }
 0x6c8   :  { %v720_v21 = vadd.f32 %v717_v20, %v691_v19 }
 0x6ca   :  { %v721_v22 = vmax.f32 %v720_v21, 0.0 }
 0x6cc   :  { %1055 = vmatmul.msk.f32.vlgmr.msrb.gmra.mxu1 %vm87_vm0, %v721_v22 }
 0x749   :  { %v752_v28 = vpop.f32.mrf.mxu1 }
 0x74a   :  { %v753_v29 = vadd.f32 %v1103_v27, %v752_v28 }
 0x74c   :  { %v755_v30 = vmax.f32 %v753_v29, 0.0 }
 0x74e   :  { %1061 = vmatmul.msk.f32.vlgmr.msrb.gmra.mxu2 %vm87_vm0, %v755_v30  ;;  %1068 = vmatmul.msk.f32.vlgmr.msra.gmra.mxu0 %vm87_vm0, %v755_v30 }
 0x7cb   :  { %v841_v45 = vpop.f32.mrf.mxu0 }
 0x7cc   :  { %v844_v46 = vadd.f32 %v841_v45, %v817_v44 }
 0x7d1   :  { %v786_v33 = vpop.f32.mrf.mxu2 }
 0x7d2   :  { %v787_v35 = vadd.f32 %v1105_v32, %v786_v33 }
 0x7d4   :  { %951 = vrot.lane.b32.xlu1 %v787_v35, %s1217_s14  ;;  %1071 = vmatmul.msk.f32.vlgmr.msra.gmra.mxu1 %vm233_vm2, %v787_v35 }
 0x846   :  { %v952_v63 = vpop.permute.xlu1 %951 }
 0x847   :  { %v964_v2 = vsel %vm963_vm5, %v962_v1, %v952_v63 }
 0x851   :  { %v870_v47 = vpop.f32.mrf.mxu1 }
 0x852   :  { %v873_v48 = vadd.f32 %v870_v47, %v844_v46 }
 0x854   :  { %v874_v49 = vmax.f32 %v873_v48, 0.0 }
 0x856   :  { %1073 = vmatmul.msk.f32.vlgmr.msra.gmra.mxu2 %vm87_vm0, %v874_v49 }
 0x8d9   :  { %v905_v53 = vpop.f32.mrf.mxu2 }
 0x8da   :  { %v906_v54 = vadd.f32 %v1106_v52, %v905_v53 }
 0x8dc   :  { %v908_v55 = vmax.f32 %v906_v54, 0.0 }
 0x8de   :  { %1079 = vmatmul.msk.f32.vlgmr.msra.gmra.mxu3 %vm87_vm0, %v908_v55 }
 0x961   :  { %v939_v57 = vpop.f32.mrf.mxu3 }
 0x962   :  { %v940_v58 = vadd.f32 %v1107_v56, %v939_v57 }
 0x964   :  { %955 = vrot.lane.b32.xlu2 %v940_v58, %s1218_s25 }
 0x9be   :  { %v956_v3 = vpop.permute.xlu2 %955 }
 0x9bf   :  { %v966_v4 = vsel %vm965_vm6, %v964_v2, %v956_v3 }
 0x9c0   :  { %968 = vst.msk [vmem:[#allocation8] sm:$0x3] %vm967_vm7, %v966_v4 }
 0x9c1   :  { %979 = dma.vmem_to_hbm [thread:$0]  %s975_s7, 32, %s977_s8, [#allocation4]  }
 0x9c2   :  { %1208 = dma.done.wait [#allocation4], 32  }
 0x9c3   :  { %1209 = vsyncadd [#allocation4], 4294967264 }
 0x9c4   :  { %984 = vsyncpa [#allocation3], 1 }
 0x9c5   :  { %985 = vsyncpa [#allocation6], 1 }
 0x9c6   :  { %986 = vsyncpa [#allocation4], 1 }

</bundles_post_ra>
